<compile_context>
chip_gen: v5e
topology: v5e:2x2
jax: 0.10.0
libtpu: 0.0.40
codegen_flags: <defaults>
</compile_context>

<pallas_src>
import jax
import jax.numpy as jnp
from jax.experimental import pallas as pl
from jax.experimental.pallas import tpu as pltpu


# ---------------------------------------------------------------------------
# Kernel: one (tile_n, tile_t, C) block of x times the (tile_n, 1, C) mask.
# ---------------------------------------------------------------------------
def _spatial_dropout_kernel(mask_ref, x_ref, o_ref):
    # mask_ref: (tile_n, 1, C) in x.dtype; broadcasts over the sequence tile.
    o_ref[...] = x_ref[...] * mask_ref[...]


# ---------------------------------------------------------------------------
# Wrapper-side helpers.
# ---------------------------------------------------------------------------
def make_spatial_dropout_mask(key, n, c, drop_prob, dtype):
    """(N, 1, C) inverted-dropout mask: Bernoulli(1 - p) / (1 - p), in `dtype`."""
    keep_prob = 1.0 - float(drop_prob)
    keep = jax.random.bernoulli(key, p=keep_prob, shape=(n, 1, c))
    return jnp.where(keep, 1.0 / keep_prob, 0.0).astype(dtype)


def _divisors(n):
    ds = []
    d = 1
    while d * d <= n:
        if n % d == 0:
            ds.append(d)
            ds.append(n // d)
        d += 1
    return ds


def _choose_tiles(n, t, c, itemsize, budget_bytes):
    """Pick (tile_n, tile_t) so one x/out block stays under ~budget_bytes."""
    pack = max(8, 32 // itemsize)          # sublane pack: 8 f32 / 16 bf16 / 32 i8
    slab = t * c * itemsize                # one full (1, T, C) batch slab

    if slab <= budget_bytes:
        # Whole per-batch slab fits: block over N too (largest divisor of N).
        tile_n = 1
        for d in _divisors(n):
            if d * slab <= budget_bytes and d > tile_n:
                tile_n = d
        return tile_n, t, pack

    # Block along T: largest divisor of T that is a multiple of `pack` and fits.
    limit = max(pack, budget_bytes // (c * itemsize))
    tile_t = 0
    for d in _divisors(t):
        if d % pack == 0 and d <= limit and d > tile_t:
            tile_t = d
    if tile_t == 0:
        # Fallback: pack-multiple tile; the final (padded) block is masked.
        tile_t = max(pack, (limit // pack) * pack)
        tile_t = min(tile_t, ((t + pack - 1) // pack) * pack)
    return 1, tile_t, pack


def spatial_dropout(x, drop_prob, key, *, training=True, budget_bytes=8 * 1024 * 1024):
    """Pallas implementation of Spatial_Dropout.forward for 3-D (N, T, C) inputs."""
    if (not training) or drop_prob == 0.0:
        return x
    if drop_prob >= 1.0:
        # PyTorch: noise.fill_(0) -> output is all zeros.  No need to read x.
        return jnp.zeros_like(x)

    assert x.ndim == 3, "spatial_dropout expects (batch, seq, features)"
    n, t, c = x.shape
    itemsize = jnp.dtype(x.dtype).itemsize

    # (N, 1, C) inverted-dropout mask, already in x.dtype (matches PyTorch's
    # same-dtype noise multiply).
    mask = make_spatial_dropout_mask(key, n, c, drop_prob, x.dtype)

    tile_n, tile_t, pack = _choose_tiles(n, t, c, itemsize, budget_bytes)

    block_bytes = tile_n * tile_t * c * itemsize
    grid_n = pl.cdiv(n, tile_n)
    grid_t = pl.cdiv(t, tile_t)
    # Keep >= 2 grid steps on a parallel axis for v7x's two TensorCores when
    # the work is big enough to matter; tiny single-block problems stay as-is.
    if grid_n * grid_t == 1 and block_bytes > (1 << 20):
        if tile_n % 2 == 0:
            tile_n //= 2
        elif tile_t % (2 * pack) == 0:
            tile_t //= 2
        block_bytes = tile_n * tile_t * c * itemsize
        grid_n = pl.cdiv(n, tile_n)
        grid_t = pl.cdiv(t, tile_t)

    # VMEM request sized from real need: double-buffered x + out blocks, the
    # (small) double-buffered mask block, plus slack for Mosaic scratch.
    mask_block_bytes = tile_n * c * itemsize
    vmem_need = 4 * block_bytes + 2 * mask_block_bytes + (2 << 20)
    vmem_limit = int(min(max(vmem_need, 4 << 20), 48 << 20))

    return pl.pallas_call(
        _spatial_dropout_kernel,
        out_shape=jax.ShapeDtypeStruct(x.shape, x.dtype),
        grid=(grid_n, grid_t),
        in_specs=[
            # Same (tile_n, 1, C) mask rows for every T tile of a batch block.
            pl.BlockSpec((tile_n, 1, c), lambda ni, ti: (ni, 0, 0)),
            pl.BlockSpec((tile_n, tile_t, c), lambda ni, ti: (ni, ti, 0)),
        ],
        out_specs=pl.BlockSpec((tile_n, tile_t, c), lambda ni, ti: (ni, ti, 0)),
        compiler_params=pltpu.CompilerParams(
            dimension_semantics=("parallel", "parallel"),
            vmem_limit_bytes=vmem_limit,
        ),
    )(mask, x)


# ---------------------------------------------------------------------------
# Self-test.
# ---------------------------------------------------------------------------
if __name__ == "__main__":
    root = jax.random.PRNGKey(0)
    key_x, key_mask, key_x2, key_mask2 = jax.random.split(root, 4)

    drop_prob = 0.5
    keep_prob = 1.0 - drop_prob

    # Primary shape consistent with the module's 3-D usage, lane-dense C:
    # batch=2, seq=8, hidden=128.
    N, T, C = 2, 8, 128
    x = jax.random.normal(key_x, (N, T, C), dtype=jnp.float32)

    out = jax.block_until_ready(spatial_dropout(x, drop_prob, key_mask, training=True))
    assert out.shape == x.shape and out.dtype == x.dtype

    # Exact reference built from the same wrapper-side mask.
    ref_mask = make_spatial_dropout_mask(key_mask, N, C, drop_prob, x.dtype)  # (N,1,C)
    ref = x * ref_mask
    assert jnp.allclose(out, ref, rtol=1e-6, atol=1e-6)

    # Mask is constant along the sequence axis and takes values in {0, 1/(1-p)}.
    ratio = out / jnp.where(jnp.abs(x) > 1e-6, x, 1.0)
    assert bool(jnp.allclose(ratio, ratio[:, :1, :], atol=1e-5))
    assert bool(
        jnp.all(
            (jnp.abs(ratio) < 1e-5) | (jnp.abs(ratio - 1.0 / keep_prob) < 1e-4)
        )
    )

    # Secondary small shape with C not a multiple of 128 (masked-store path).
    N2, T2, C2 = 2, 8, 32
    x2 = jax.random.normal(key_x2, (N2, T2, C2), dtype=jnp.float32)
    out2 = jax.block_until_ready(spatial_dropout(x2, drop_prob, key_mask2, training=True))
    ref2 = x2 * make_spatial_dropout_mask(key_mask2, N2, C2, drop_prob, x2.dtype)
    assert jnp.allclose(out2, ref2, rtol=1e-6, atol=1e-6)

    # Eval / p == 0 / p == 1 paths never launch the kernel.
    out_eval = jax.block_until_ready(
        spatial_dropout(x, drop_prob, key_mask, training=False)
    )
    assert jnp.array_equal(out_eval, x)
    out_p0 = jax.block_until_ready(spatial_dropout(x, 0.0, key_mask, training=True))
    assert jnp.array_equal(out_p0, x)
    out_p1 = jax.block_until_ready(spatial_dropout(x, 1.0, key_mask, training=True))
    assert bool(jnp.all(out_p1 == 0))

    print("KERNEL_OK")
</pallas_src>

<mosaic_0001>
module attributes {stable_mosaic.version = 11 : i64} {
  func.func @_spatial_dropout_kernel(%arg0: i32, %arg1: i32, %arg2: memref<2x1x128xf32, #tpu.memory_space<vmem>>, %arg3: memref<2x8x128xf32, #tpu.memory_space<vmem>>, %arg4: memref<2x8x128xf32, #tpu.memory_space<vmem>>) attributes {dimension_semantics = [#tpu.dimension_semantics<parallel>, #tpu.dimension_semantics<parallel>], iteration_bounds = array<i64: 1, 1>, scalar_prefetch = 0 : i64, scratch_operands = 0 : i64, tpu.core_type = #tpu.core_type<tc>, window_params = [{transform_indices = @transform_0, window_bounds = array<i64: 2, 1, 128>}, {transform_indices = @transform_1, window_bounds = array<i64: 2, 8, 128>}, {transform_indices = @transform_2, window_bounds = array<i64: 2, 8, 128>}]} {
    %c0 = arith.constant 0 : index
    %c0_0 = arith.constant 0 : index
    %c0_1 = arith.constant 0 : index
    %0 = vector.load %arg3[%c0, %c0_0, %c0_1] : memref<2x8x128xf32, #tpu.memory_space<vmem>>, vector<2x8x128xf32>
    %c0_2 = arith.constant 0 : index
    %c0_3 = arith.constant 0 : index
    %c0_4 = arith.constant 0 : index
    %1 = vector.load %arg2[%c0_2, %c0_3, %c0_4] : memref<2x1x128xf32, #tpu.memory_space<vmem>>, vector<2x1x128xf32>
    %2 = vector.broadcast %1 : vector<2x1x128xf32> to vector<2x8x128xf32>
    %3 = arith.mulf %0, %2 : vector<2x8x128xf32>
    %c0_5 = arith.constant 0 : index
    %c0_6 = arith.constant 0 : index
    %c0_7 = arith.constant 0 : index
    %4 = vector.load %arg4[%c0_5, %c0_6, %c0_7] : memref<2x8x128xf32, #tpu.memory_space<vmem>>, vector<2x8x128xf32>
    tpu.vector_store %arg4[%c0_5, %c0_6, %c0_7], %3 {strides = array<i32>} : memref<2x8x128xf32, #tpu.memory_space<vmem>>, vector<2x8x128xf32>,
    return
  }
  func.func @transform_0(%arg0: i32, %arg1: i32) -> (i32, i32, i32) {
    %c0_i32 = arith.constant 0 : i32
    %c0_i32_0 = arith.constant 0 : i32
    %c0_i32_1 = arith.constant 0 : i32
    return %arg0, %c0_i32, %c0_i32_0 : i32, i32, i32
  }
  func.func @transform_1(%arg0: i32, %arg1: i32) -> (i32, i32, i32) {
    %c0_i32 = arith.constant 0 : i32
    %c0_i32_0 = arith.constant 0 : i32
    return %arg0, %arg1, %c0_i32 : i32, i32, i32
  }
  func.func @transform_2(%arg0: i32, %arg1: i32) -> (i32, i32, i32) {
    %c0_i32 = arith.constant 0 : i32
    %c0_i32_0 = arith.constant 0 : i32
    return %arg0, %arg1, %c0_i32 : i32, i32, i32
  }
}

</mosaic_0001>

<bundles_post_ra>
// kernel: tpu_custom_call.1
= control target key start
LH: loop header
LB: loop body
LE: loop exit
PB: predicated region body
PF: predicated region fallthrough
CT: control target
= control target key end

     0   :  { %7 = vsyncpa [#allocation3], 0  ;;  %s196_s0 = inlined_call_operand.hbm [shape: f32[2,1,128], index: 0, kind: input, shape index: {}]   ;;  %s197_s1 = inlined_call_operand.hbm [shape: f32[2,8,128], index: 1, kind: input, shape index: {}]   ;;  %s198_s2 = inlined_call_operand.hbm [shape: f32[2,8,128], index: 2, kind: output, shape index: {}]  }
   0x1   :  { %8 = vsyncpa [#allocation6], 0 }
   0x2   :  { %9 = vsyncpa [#allocation4], 0  ;;  %s14_s11 = sshll.u32 %s196_s0, 4  ;;  %s165_s12 = smov [#allocation2]   ;;  %s15_s11 = int_to_ptr.hbm [resolvable:$true] %s14_s11 }
   0x3   :  { %s16_s13 = sshll.u32 %s165_s12, 4  ;;  %s27_s16 = sshll.u32 %s197_s1, 4  ;;  %s17_s13 = int_to_ptr.vmem [resolvable:$true] %s16_s13  ;;  %s28_s16 = int_to_ptr.hbm [resolvable:$true] %s27_s16 }
   0x4   :  { %s166_s17 = smov 16   ;;  %s167_s18 = smov 1  }
   0x5   :  { %22 = dma.hbm_to_vmem [thread:$0]  %s15_s11, 32, %s17_s13, [#allocation3], %s166_s17, %s166_s17, %s167_s18  }
   0x6   :  { %s168_s19 = smov [#allocation5]   ;;  %s169_s21 = smov 128  }
   0x7   :  { %s29_s20 = sshll.u32 %s168_s19, 4  ;;  %s170_s22 = smov 8   ;;  %s30_s20 = int_to_ptr.vmem [resolvable:$true] %s29_s20 }
   0x8   :  { %35 = dma.hbm_to_vmem [thread:$0]  %s28_s16, 256, %s30_s20, [#allocation6], %s169_s21, %s169_s21, %s170_s22  }
   0x9   :  { %159 = dma.done.wait [#allocation3], 32  }
   0xa   :  { %160 = vsyncadd [#allocation3], 4294967264 }
   0xb   :  { %161 = dma.done.wait [#allocation6], 256  }
   0xc   :  { %162 = vsyncadd [#allocation6], 4294967040  ;;  %s64_s24 = sshll.u32 %s198_s2, 4  ;;  %v44_v0 = vld [vmem:[#allocation5] sm:$0xff]  ;;  %v85_v1 = vld [vmem:[#allocation2] ss:$0 sm:$0xff]  ;;  %s65_s24 = int_to_ptr.hbm [resolvable:$true] %s64_s24 }
   0xd   :  { %s171_s1 = smov [#allocation7]   ;;  %v45_v2 = vld [vmem:[#allocation5 + $0x8] sm:$0xff]  ;;  %v86_v3 = vld [vmem:[#allocation2 + $0x1] ss:$0 sm:$0xff]  ;;  %v54_v4 = vmul.f32 %v85_v1, %v44_v0 }
   0xe   :  { %s62_s25 = sshll.u32 %s171_s1, 4  ;;  %v55_v5 = vmul.f32 %v86_v3, %v45_v2  ;;  %s63_s25 = int_to_ptr.vmem [resolvable:$true] %s62_s25 }
   0xf   :  { %56 = vst [vmem:[#allocation7] sm:$0xff] %v54_v4 }
  0x10   :  { %57 = vst [vmem:[#allocation7 + $0x8] sm:$0xff] %v55_v5 }
  0x11   :  { %70 = dma.vmem_to_hbm [thread:$0]  %s63_s25, 256, %s65_s24, [#allocation4], %s169_s21, %s169_s21, %s170_s22  }
  0x12   :  { %163 = dma.done.wait [#allocation4], 256  }
  0x13   :  { %164 = vsyncadd [#allocation4], 4294967040 }
  0x14   :  { %75 = vsyncpa [#allocation3], 1 }
  0x15   :  { %76 = vsyncpa [#allocation6], 1 }
  0x16   :  { %77 = vsyncpa [#allocation4], 1 }

</bundles_post_ra>
